<compile_context>
chip_gen: v7x
topology: tpu7x:2x2x1
jax: 0.10.0
libtpu: 0.0.40
codegen_flags: <defaults>
</compile_context>

<pallas_src>
import functools

import jax
import jax.numpy as jnp
from jax.experimental import pallas as pl
from jax.experimental.pallas import tpu as pltpu

EPS_BN = 1e-5

# Module constants (from vgae_motif.py)
OUT_CHANNELS = 48
LAMBDA_DIM = 32
NODE_TRNS_LAYERS = [OUT_CHANNELS, 64, LAMBDA_DIM]      # decoder mlp gets + [LAMBDA_DIM]
NUM_REL = 2

# Synthetic problem size
N_NODES = 64
D_IN = 16
ENC_LAYERS = [64, OUT_CHANNELS]                        # encoder node_mlp layers
BATCH = 8

ADJ_OFF = 64                                           # adj starts at lane 64 in the packed slab
OUT_LANES = ADJ_OFF + N_NODES                          # 128-lane packed output: [z | pad | adj]


# ----------------------------- fused kernel ----------------------------------

def _gae_fused_kernel(n_enc, n_dec, x_ref, *refs):
    """Encoder node_mlp -> z, then MultiLatetnt_SBM_decoder -> sigmoid(adj).

    refs layout (grid=(B,), all param refs have constant index_maps => VMEM-resident):
      enc:  [w0, b0, w1, b1]                 w bf16 (Cin, Cout), b f32 (1, Cout)
      dec:  [W0, B0, ..., W3, B3]            relation-fused: W0 concat along Cout,
                                             W1..W3 block-diagonal, B concat
      lam:  (R*Ld, R*Ld) bf16                block-diag(Lambda_0, Lambda_1)
      out:  (1, N, OUT_LANES) f32            packed [z | 0 pad | adj]
    """
    enc_refs = refs[:2 * n_enc]
    dec_refs = refs[2 * n_enc:2 * n_enc + 2 * n_dec]
    lam_ref = refs[2 * n_enc + 2 * n_dec]
    out_ref = refs[2 * n_enc + 2 * n_dec + 1]

    n = x_ref.shape[1]

    # ---- encoder (GAE.forward / GAE.encode): eval-mode BN folded into W/b ----
    h = x_ref[0].astype(jnp.bfloat16)                    # (N, D_IN)
    for l in range(n_enc):
        w, b = enc_refs[2 * l], enc_refs[2 * l + 1]
        pre = jnp.dot(h, w[...], preferred_element_type=jnp.float32) + b[...]
        h = jnp.tanh(pre.astype(jnp.bfloat16))           # bf16 EUP tanh
    z = h                                                # bf16 (N, OUT_CHANNELS)

    # ---- decoder (GAE.decode): both relations fused lane-concatenated ----
    h = z
    for l in range(n_dec):
        w, b = dec_refs[2 * l], dec_refs[2 * l + 1]
        pre = jnp.dot(h, w[...], preferred_element_type=jnp.float32) + b[...]
        h = jnp.tanh(pre.astype(jnp.bfloat16))
    # h: (N, R*Ld) = [h_0 | h_1]; lam is block-diag(Lambda_0, Lambda_1), so
    # (h @ lam) contracted against h over the concatenated R*Ld axis gives
    # sum_r h_r @ (Lambda_r @ h_r^T) directly (no transpose, no partial-sum add).
    hl = jnp.dot(h, lam_ref[...], preferred_element_type=jnp.float32)       # (N, R*Ld)
    adj = jax.lax.dot_general(hl.astype(jnp.bfloat16), h,
                              dimension_numbers=(((1,), (1,)), ((), ())),
                              preferred_element_type=jnp.float32)           # (N, N)
    adj = jax.nn.sigmoid(adj)

    # one unmasked 128-lane store per graph: [z (48) | zeros (16) | adj (64)]
    z_f32 = z.astype(jnp.float32)
    pad = jnp.zeros((n, ADJ_OFF - z_f32.shape[1]), jnp.float32)
    out_ref[0] = jnp.concatenate([z_f32, pad, adj], axis=-1)


# ----------------------------- wrapper ---------------------------------------

def gae_forward_pallas(x, enc_wb, dec_wb, lam_bd):
    """x: (B, N, D_IN) f32.  Returns (z, adj): z (B, N, OUT_CHANNELS) == GAE.encode,
    adj (B, N, N) == GAE.decode(z) with sigmoid=True."""
    bsz, n, d_in = x.shape
    out_lanes = ADJ_OFF + n

    flat = [x]
    for w, b in enc_wb:
        flat += [w, b]
    for w, b in dec_wb:
        flat += [w, b]
    flat.append(lam_bd)

    def const_spec(a):
        nd = a.ndim
        # whole-array block, constant index_map -> DMA'd once, stays VMEM-resident
        return pl.BlockSpec(a.shape, lambda b, _nd=nd: (0,) * _nd,
                            memory_space=pltpu.MemorySpace.VMEM)

    in_specs = [pl.BlockSpec((1, n, d_in), lambda b: (b, 0, 0),
                             memory_space=pltpu.MemorySpace.VMEM)]
    in_specs += [const_spec(a) for a in flat[1:]]
    out_specs = pl.BlockSpec((1, n, out_lanes), lambda b: (b, 0, 0),
                             memory_space=pltpu.MemorySpace.VMEM)

    # Advisory cost estimate (per-call totals).
    mm_flops = 0
    for w, _ in enc_wb + dec_wb:
        mm_flops += 2 * n * int(w.shape[0]) * int(w.shape[1])
    mm_flops += 2 * n * int(lam_bd.shape[0]) * int(lam_bd.shape[1])   # h @ Lambda_bd
    mm_flops += 2 * n * n * int(lam_bd.shape[1])                      # (h Lambda) @ h^T
    trans = n * (sum(int(w.shape[1]) for w, _ in enc_wb + dec_wb) + n)
    param_bytes = sum(int(a.size) * a.dtype.itemsize for a in flat[1:])
    cost = pl.CostEstimate(
        flops=bsz * mm_flops,
        transcendentals=bsz * trans,
        bytes_accessed=int(x.size) * 4 + param_bytes + bsz * n * out_lanes * 4,
    )

    out = pl.pallas_call(
        functools.partial(_gae_fused_kernel, len(enc_wb), len(dec_wb)),
        grid=(bsz,),
        in_specs=in_specs,
        out_specs=out_specs,
        out_shape=jax.ShapeDtypeStruct((bsz, n, out_lanes), jnp.float32),
        compiler_params=pltpu.CompilerParams(
            dimension_semantics=("parallel",)),        # shard batch across TCs on v7x
        cost_estimate=cost,
    )(*flat)

    z = out[:, :, :OUT_CHANNELS]
    adj = out[:, :, ADJ_OFF:ADJ_OFF + n]
    return z, adj


# ----------------------------- parameter setup (glue) ------------------------

def _make_linear(key, cin, cout):
    kw, kb = jax.random.split(key)
    bound = cin ** -0.5
    w = jax.random.uniform(kw, (cin, cout), jnp.float32, -bound, bound)   # stored (in, out)
    b = jax.random.uniform(kb, (1, cout), jnp.float32, -bound, bound)
    return w, b


def _make_bn(key, cin):
    # Non-trivial eval-mode running statistics / affine params (exercises the fold).
    kg, kb, km, kv = jax.random.split(key, 4)
    gamma = jax.random.uniform(kg, (1, cin), jnp.float32, 0.8, 1.2)
    beta = jax.random.uniform(kb, (1, cin), jnp.float32, -0.2, 0.2)
    mean = jax.random.uniform(km, (1, cin), jnp.float32, -0.3, 0.3)
    var = jax.random.uniform(kv, (1, cin), jnp.float32, 0.8, 1.25)
    scale = gamma / jnp.sqrt(var + EPS_BN)
    shift = beta - mean * scale
    return scale, shift


def build_params(key):
    k_enc, k_dec, k_lam = jax.random.split(key, 3)

    # Encoder node_mlp: dims [D_IN] + ENC_LAYERS
    enc_dims = [D_IN] + ENC_LAYERS
    enc_params = []
    for l, k in enumerate(jax.random.split(k_enc, len(enc_dims) - 1)):
        kl, kn = jax.random.split(k)
        w, b = _make_linear(kl, enc_dims[l], enc_dims[l + 1])
        scale, shift = _make_bn(kn, enc_dims[l])
        enc_params.append(dict(scale=scale, shift=shift, w=w, b=b))

    # Decoder: NUM_REL node_mlps with dims [in_dim] + node_trns_layers + [Lambda_dim]
    dec_dims = [OUT_CHANNELS] + NODE_TRNS_LAYERS + [LAMBDA_DIM]
    rel_keys = jax.random.split(k_dec, NUM_REL)
    dec_params = []
    for l in range(len(dec_dims) - 1):
        ws, bs, ss, ts = [], [], [], []
        for r in range(NUM_REL):
            k = jax.random.fold_in(rel_keys[r], l)
            kl, kn = jax.random.split(k)
            w, b = _make_linear(kl, dec_dims[l], dec_dims[l + 1])
            scale, shift = _make_bn(kn, dec_dims[l])
            ws.append(w); bs.append(b); ss.append(scale); ts.append(shift)
        dec_params.append(dict(
            scale=jnp.stack(ss),            # (R, 1, Cin)
            shift=jnp.stack(ts),            # (R, 1, Cin)
            w=jnp.stack(ws),                # (R, Cin, Cout)
            b=jnp.stack(bs),                # (R, 1, Cout)
        ))

    # Lambdas: xavier_uniform_((Lambda_dim, Lambda_dim)) per relation
    xav = float(jnp.sqrt(6.0 / (LAMBDA_DIM + LAMBDA_DIM)))
    lambdas = jax.random.uniform(k_lam, (NUM_REL, LAMBDA_DIM, LAMBDA_DIM),
                                 jnp.float32, -xav, xav)
    return enc_params, dec_params, lambdas


def fold_params(enc_params, dec_params, lambdas):
    """Host-side packing:
       * fold eval-mode BatchNorm (scale, shift) into each Linear:
           (h*s + t) @ W + b  ==  h @ (diag(s) W) + (t @ W + b)
       * fuse the NUM_REL decoder relation MLPs into one lane-concatenated stream:
           layer 0 (shared z input): concat along Cout; deeper layers: block-diagonal;
           Lambda: block-diagonal.
       Weights stored bf16 (MXU-native), biases stay f32."""
    enc_wb = []
    for p in enc_params:
        w = (p["w"] * jnp.swapaxes(p["scale"], 0, 1)).astype(jnp.bfloat16)   # (Cin, Cout)
        b = (p["b"] + p["shift"] @ p["w"]).astype(jnp.float32)               # (1, Cout)
        enc_wb.append((w, b))

    dec_wb = []
    for l, p in enumerate(dec_params):
        ws, bs = [], []
        for r in range(p["w"].shape[0]):
            w_r = p["w"][r] * jnp.swapaxes(p["scale"][r], 0, 1)              # (Cin, Cout)
            b_r = p["b"][r] + p["shift"][r] @ p["w"][r]                      # (1, Cout)
            ws.append(w_r); bs.append(b_r)
        if l == 0:
            w_packed = jnp.concatenate(ws, axis=1)           # (Cin, R*Cout)  shared z input
        else:
            w_packed = jax.scipy.linalg.block_diag(*ws)      # (R*Cin, R*Cout)
        b_packed = jnp.concatenate(bs, axis=1)               # (1, R*Cout)
        dec_wb.append((w_packed.astype(jnp.bfloat16), b_packed.astype(jnp.float32)))

    lam_bd = jax.scipy.linalg.block_diag(
        *[lambdas[r] for r in range(lambdas.shape[0])]).astype(jnp.bfloat16)  # (R*Ld, R*Ld)
    return enc_wb, dec_wb, lam_bd


# ----------------------------- pure-JAX reference ----------------------------

def ref_forward_single(x, enc_params, dec_params, lambdas):
    """Unfolded, per-relation f32 reference for ONE graph (matches the PyTorch module
    in eval mode: BN(running stats) -> dropout(identity) -> Linear -> tanh each layer)."""
    h = x
    for p in enc_params:
        h = jnp.tanh((h * p["scale"] + p["shift"]) @ p["w"] + p["b"])
    z = h
    acc = jnp.zeros((x.shape[0], x.shape[0]), jnp.float32)
    for r in range(lambdas.shape[0]):
        h = z
        for p in dec_params:
            h = jnp.tanh((h * p["scale"][r] + p["shift"][r]) @ p["w"][r] + p["b"][r])
        acc = acc + h @ (lambdas[r] @ h.T)
    return z, jax.nn.sigmoid(acc)


# ----------------------------- main ------------------------------------------

if __name__ == "__main__":
    key = jax.random.PRNGKey(0)
    k_x, k_p = jax.random.split(key)
    x = jax.random.normal(k_x, (BATCH, N_NODES, D_IN), jnp.float32)

    enc_params, dec_params, lambdas = build_params(k_p)
    enc_wb, dec_wb, lam_bd = fold_params(enc_params, dec_params, lambdas)

    # Fused batched call: z == GAE.forward / GAE.encode, adj == GAE.decode (sigmoid=True)
    z, adj = gae_forward_pallas(x, enc_wb, dec_wb, lam_bd)
    jax.block_until_ready((z, adj))

    z_ref, adj_ref = jax.vmap(
        lambda xg: ref_forward_single(xg, enc_params, dec_params, lambdas))(x)

    assert z.shape == (BATCH, N_NODES, OUT_CHANNELS)
    assert adj.shape == (BATCH, N_NODES, N_NODES)
    # bf16 MXU/EUP inputs + host BN-fold (with non-trivial running stats) change
    # rounding slightly; f32 accumulation kept throughout.
    assert jnp.allclose(z, z_ref, atol=3e-2, rtol=3e-2)
    assert jnp.allclose(adj, adj_ref, atol=3e-2, rtol=3e-2)

    print("KERNEL_OK")
</pallas_src>

<mosaic_0001>
module attributes {stable_mosaic.version = 11 : i64} {
  func.func @_gae_fused_kernel(%arg0: i32, %arg1: memref<1x64x16xf32, #tpu.memory_space<vmem>>, %arg2: memref<16x64xbf16, #tpu.memory_space<vmem>>, %arg3: memref<1x64xf32, #tpu.memory_space<vmem>>, %arg4: memref<64x48xbf16, #tpu.memory_space<vmem>>, %arg5: memref<1x48xf32, #tpu.memory_space<vmem>>, %arg6: memref<48x96xbf16, #tpu.memory_space<vmem>>, %arg7: memref<1x96xf32, #tpu.memory_space<vmem>>, %arg8: memref<96x128xbf16, #tpu.memory_space<vmem>>, %arg9: memref<1x128xf32, #tpu.memory_space<vmem>>, %arg10: memref<128x64xbf16, #tpu.memory_space<vmem>>, %arg11: memref<1x64xf32, #tpu.memory_space<vmem>>, %arg12: memref<64x64xbf16, #tpu.memory_space<vmem>>, %arg13: memref<1x64xf32, #tpu.memory_space<vmem>>, %arg14: memref<64x64xbf16, #tpu.memory_space<vmem>>, %arg15: memref<1x64x128xf32, #tpu.memory_space<vmem>>) attributes {dimension_semantics = [#tpu.dimension_semantics<parallel>], iteration_bounds = array<i64: 8>, scalar_prefetch = 0 : i64, scratch_operands = 0 : i64, tpu.core_type = #tpu.core_type<tc>, window_params = [{transform_indices = @transform_0, window_bounds = array<i64: 1, 64, 16>}, {pipeline_mode = #tpu.pipeline_mode<synchronous>, transform_indices = @transform_1, window_bounds = array<i64: 16, 64>}, {pipeline_mode = #tpu.pipeline_mode<synchronous>, transform_indices = @transform_2, window_bounds = array<i64: 1, 64>}, {pipeline_mode = #tpu.pipeline_mode<synchronous>, transform_indices = @transform_3, window_bounds = array<i64: 64, 48>}, {pipeline_mode = #tpu.pipeline_mode<synchronous>, transform_indices = @transform_4, window_bounds = array<i64: 1, 48>}, {pipeline_mode = #tpu.pipeline_mode<synchronous>, transform_indices = @transform_5, window_bounds = array<i64: 48, 96>}, {pipeline_mode = #tpu.pipeline_mode<synchronous>, transform_indices = @transform_6, window_bounds = array<i64: 1, 96>}, {pipeline_mode = #tpu.pipeline_mode<synchronous>, transform_indices = @transform_7, window_bounds = array<i64: 96, 128>}, {pipeline_mode = #tpu.pipeline_mode<synchronous>, transform_indices = @transform_8, window_bounds = array<i64: 1, 128>}, {pipeline_mode = #tpu.pipeline_mode<synchronous>, transform_indices = @transform_9, window_bounds = array<i64: 128, 64>}, {pipeline_mode = #tpu.pipeline_mode<synchronous>, transform_indices = @transform_10, window_bounds = array<i64: 1, 64>}, {pipeline_mode = #tpu.pipeline_mode<synchronous>, transform_indices = @transform_11, window_bounds = array<i64: 64, 64>}, {pipeline_mode = #tpu.pipeline_mode<synchronous>, transform_indices = @transform_12, window_bounds = array<i64: 1, 64>}, {pipeline_mode = #tpu.pipeline_mode<synchronous>, transform_indices = @transform_13, window_bounds = array<i64: 64, 64>}, {transform_indices = @transform_14, window_bounds = array<i64: 1, 64, 128>}]} {
    %c0 = arith.constant 0 : index
    %c0_0 = arith.constant 0 : index
    %c0_1 = arith.constant 0 : index
    %0 = vector.load %arg1[%c0, %c0_0, %c0_1] : memref<1x64x16xf32, #tpu.memory_space<vmem>>, vector<1x64x16xf32>
    %1 = vector.shape_cast %0 : vector<1x64x16xf32> to vector<64x16xf32>
    %2 = arith.truncf %1 : vector<64x16xf32> to vector<64x16xbf16>
    %c0_2 = arith.constant 0 : index
    %c0_3 = arith.constant 0 : index
    %3 = vector.load %arg2[%c0_2, %c0_3] : memref<16x64xbf16, #tpu.memory_space<vmem>>, vector<16x64xbf16>
    %cst = arith.constant dense<0.000000e+00> : vector<64x64xf32>
    %4 = tpu.matmul %2, %3, %cst {dimension_numbers = #tpu.dot_dimension_numbers<[1], [0], [0], [1], [0, 0, 1, 1], [], []>} : vector<64x16xbf16>, vector<16x64xbf16>, vector<64x64xf32> -> vector<64x64xf32>
    %c0_4 = arith.constant 0 : index
    %c0_5 = arith.constant 0 : index
    %5 = vector.load %arg3[%c0_4, %c0_5] : memref<1x64xf32, #tpu.memory_space<vmem>>, vector<1x64xf32>
    %6 = vector.broadcast %5 : vector<1x64xf32> to vector<64x64xf32>
    %7 = arith.addf %4, %6 : vector<64x64xf32>
    %8 = arith.truncf %7 : vector<64x64xf32> to vector<64x64xbf16>
    %9 = math.tanh %8 : vector<64x64xbf16>
    %c0_6 = arith.constant 0 : index
    %c0_7 = arith.constant 0 : index
    %10 = vector.load %arg4[%c0_6, %c0_7] : memref<64x48xbf16, #tpu.memory_space<vmem>>, vector<64x48xbf16>
    %cst_8 = arith.constant dense<0.000000e+00> : vector<64x48xf32>
    %11 = tpu.matmul %9, %10, %cst_8 {dimension_numbers = #tpu.dot_dimension_numbers<[1], [0], [0], [1], [0, 0, 1, 1], [], []>} : vector<64x64xbf16>, vector<64x48xbf16>, vector<64x48xf32> -> vector<64x48xf32>
    %c0_9 = arith.constant 0 : index
    %c0_10 = arith.constant 0 : index
    %12 = vector.load %arg5[%c0_9, %c0_10] : memref<1x48xf32, #tpu.memory_space<vmem>>, vector<1x48xf32>
    %13 = vector.broadcast %12 : vector<1x48xf32> to vector<64x48xf32>
    %14 = arith.addf %11, %13 : vector<64x48xf32>
    %15 = arith.truncf %14 : vector<64x48xf32> to vector<64x48xbf16>
    %16 = math.tanh %15 : vector<64x48xbf16>
    %c0_11 = arith.constant 0 : index
    %c0_12 = arith.constant 0 : index
    %17 = vector.load %arg6[%c0_11, %c0_12] : memref<48x96xbf16, #tpu.memory_space<vmem>>, vector<48x96xbf16>
    %cst_13 = arith.constant dense<0.000000e+00> : vector<64x96xf32>
    %18 = tpu.matmul %16, %17, %cst_13 {dimension_numbers = #tpu.dot_dimension_numbers<[1], [0], [0], [1], [0, 0, 1, 1], [], []>} : vector<64x48xbf16>, vector<48x96xbf16>, vector<64x96xf32> -> vector<64x96xf32>
    %c0_14 = arith.constant 0 : index
    %c0_15 = arith.constant 0 : index
    %19 = vector.load %arg7[%c0_14, %c0_15] : memref<1x96xf32, #tpu.memory_space<vmem>>, vector<1x96xf32>
    %20 = vector.broadcast %19 : vector<1x96xf32> to vector<64x96xf32>
    %21 = arith.addf %18, %20 : vector<64x96xf32>
    %22 = arith.truncf %21 : vector<64x96xf32> to vector<64x96xbf16>
    %23 = math.tanh %22 : vector<64x96xbf16>
    %c0_16 = arith.constant 0 : index
    %c0_17 = arith.constant 0 : index
    %24 = vector.load %arg8[%c0_16, %c0_17] : memref<96x128xbf16, #tpu.memory_space<vmem>>, vector<96x128xbf16>
    %cst_18 = arith.constant dense<0.000000e+00> : vector<64x128xf32>
    %25 = tpu.matmul %23, %24, %cst_18 {dimension_numbers = #tpu.dot_dimension_numbers<[1], [0], [0], [1], [0, 0, 1, 1], [], []>} : vector<64x96xbf16>, vector<96x128xbf16>, vector<64x128xf32> -> vector<64x128xf32>
    %c0_19 = arith.constant 0 : index
    %c0_20 = arith.constant 0 : index
    %26 = vector.load %arg9[%c0_19, %c0_20] : memref<1x128xf32, #tpu.memory_space<vmem>>, vector<1x128xf32>
    %27 = vector.broadcast %26 : vector<1x128xf32> to vector<64x128xf32>
    %28 = arith.addf %25, %27 : vector<64x128xf32>
    %29 = arith.truncf %28 : vector<64x128xf32> to vector<64x128xbf16>
    %30 = math.tanh %29 : vector<64x128xbf16>
    %c0_21 = arith.constant 0 : index
    %c0_22 = arith.constant 0 : index
    %31 = vector.load %arg10[%c0_21, %c0_22] : memref<128x64xbf16, #tpu.memory_space<vmem>>, vector<128x64xbf16>
    %cst_23 = arith.constant dense<0.000000e+00> : vector<64x64xf32>
    %32 = tpu.matmul %30, %31, %cst_23 {dimension_numbers = #tpu.dot_dimension_numbers<[1], [0], [0], [1], [0, 0, 1, 1], [], []>} : vector<64x128xbf16>, vector<128x64xbf16>, vector<64x64xf32> -> vector<64x64xf32>
    %c0_24 = arith.constant 0 : index
    %c0_25 = arith.constant 0 : index
    %33 = vector.load %arg11[%c0_24, %c0_25] : memref<1x64xf32, #tpu.memory_space<vmem>>, vector<1x64xf32>
    %34 = vector.broadcast %33 : vector<1x64xf32> to vector<64x64xf32>
    %35 = arith.addf %32, %34 : vector<64x64xf32>
    %36 = arith.truncf %35 : vector<64x64xf32> to vector<64x64xbf16>
    %37 = math.tanh %36 : vector<64x64xbf16>
    %c0_26 = arith.constant 0 : index
    %c0_27 = arith.constant 0 : index
    %38 = vector.load %arg12[%c0_26, %c0_27] : memref<64x64xbf16, #tpu.memory_space<vmem>>, vector<64x64xbf16>
    %cst_28 = arith.constant dense<0.000000e+00> : vector<64x64xf32>
    %39 = tpu.matmul %37, %38, %cst_28 {dimension_numbers = #tpu.dot_dimension_numbers<[1], [0], [0], [1], [0, 0, 1, 1], [], []>} : vector<64x64xbf16>, vector<64x64xbf16>, vector<64x64xf32> -> vector<64x64xf32>
    %c0_29 = arith.constant 0 : index
    %c0_30 = arith.constant 0 : index
    %40 = vector.load %arg13[%c0_29, %c0_30] : memref<1x64xf32, #tpu.memory_space<vmem>>, vector<1x64xf32>
    %41 = vector.broadcast %40 : vector<1x64xf32> to vector<64x64xf32>
    %42 = arith.addf %39, %41 : vector<64x64xf32>
    %43 = arith.truncf %42 : vector<64x64xf32> to vector<64x64xbf16>
    %44 = math.tanh %43 : vector<64x64xbf16>
    %c0_31 = arith.constant 0 : index
    %c0_32 = arith.constant 0 : index
    %45 = vector.load %arg14[%c0_31, %c0_32] : memref<64x64xbf16, #tpu.memory_space<vmem>>, vector<64x64xbf16>
    %cst_33 = arith.constant dense<0.000000e+00> : vector<64x64xf32>
    %46 = tpu.matmul %44, %45, %cst_33 {dimension_numbers = #tpu.dot_dimension_numbers<[1], [0], [0], [1], [0, 0, 1, 1], [], []>} : vector<64x64xbf16>, vector<64x64xbf16>, vector<64x64xf32> -> vector<64x64xf32>
    %47 = arith.truncf %46 : vector<64x64xf32> to vector<64x64xbf16>
    %cst_34 = arith.constant dense<0.000000e+00> : vector<64x64xf32>
    %48 = tpu.matmul %47, %44, %cst_34 {dimension_numbers = #tpu.dot_dimension_numbers<[1], [1], [0], [0], [0, 0, 1, 0], [], []>} : vector<64x64xbf16>, vector<64x64xbf16>, vector<64x64xf32> -> vector<64x64xf32>
    %49 = arith.negf %48 : vector<64x64xf32>
    %50 = math.exp %49 : vector<64x64xf32>
    %cst_35 = arith.constant 1.000000e+00 : f32
    %51 = vector.broadcast %cst_35 : f32 to vector<64x64xf32>
    %52 = arith.addf %51, %50 : vector<64x64xf32>
    %53 = arith.divf %51, %52 : vector<64x64xf32>
    %54 = arith.extf %16 : vector<64x48xbf16> to vector<64x48xf32>
    %cst_36 = arith.constant 0.000000e+00 : f32
    %55 = vector.broadcast %cst_36 : f32 to vector<64x16xf32>
    %56 = tpu.concatenate %54, %55, %53 in 1 : vector<64x48xf32>, vector<64x16xf32>, vector<64x64xf32> -> vector<64x128xf32>
    %c0_37 = arith.constant 0 : index
    %c0_38 = arith.constant 0 : index
    %c0_39 = arith.constant 0 : index
    %57 = vector.load %arg15[%c0_37, %c0_38, %c0_39] : memref<1x64x128xf32, #tpu.memory_space<vmem>>, vector<1x64x128xf32>
    %58 = vector.shape_cast %57 : vector<1x64x128xf32> to vector<64x128xf32>
    %59 = vector.shape_cast %56 : vector<64x128xf32> to vector<1x64x128xf32>
    tpu.vector_store %arg15[%c0_37, %c0_38, %c0_39], %59 {strides = array<i32>} : memref<1x64x128xf32, #tpu.memory_space<vmem>>, vector<1x64x128xf32>,
    return
  }
  func.func @transform_0(%arg0: i32) -> (i32, i32, i32) {
    %c0_i32 = arith.constant 0 : i32
    %c0_i32_0 = arith.constant 0 : i32
    %c0_i32_1 = arith.constant 0 : i32
    return %arg0, %c0_i32, %c0_i32_0 : i32, i32, i32
  }
  func.func @transform_1(%arg0: i32) -> (i32, i32) {
    %c0_i32 = arith.constant 0 : i32
    %c0_i32_0 = arith.constant 0 : i32
    %c0_i32_1 = arith.constant 0 : i32
    return %c0_i32, %c0_i32_0 : i32, i32
  }
  func.func @transform_2(%arg0: i32) -> (i32, i32) {
    %c0_i32 = arith.constant 0 : i32
    %c0_i32_0 = arith.constant 0 : i32
    %c0_i32_1 = arith.constant 0 : i32
    return %c0_i32, %c0_i32_0 : i32, i32
  }
  func.func @transform_3(%arg0: i32) -> (i32, i32) {
    %c0_i32 = arith.constant 0 : i32
    %c0_i32_0 = arith.constant 0 : i32
    %c0_i32_1 = arith.constant 0 : i32
    return %c0_i32, %c0_i32_0 : i32, i32
  }
  func.func @transform_4(%arg0: i32) -> (i32, i32) {
    %c0_i32 = arith.constant 0 : i32
    %c0_i32_0 = arith.constant 0 : i32
    %c0_i32_1 = arith.constant 0 : i32
    return %c0_i32, %c0_i32_0 : i32, i32
  }
  func.func @transform_5(%arg0: i32) -> (i32, i32) {
    %c0_i32 = arith.constant 0 : i32
    %c0_i32_0 = arith.constant 0 : i32
    %c0_i32_1 = arith.constant 0 : i32
    return %c0_i32, %c0_i32_0 : i32, i32
  }
  func.func @transform_6(%arg0: i32) -> (i32, i32) {
    %c0_i32 = arith.constant 0 : i32
    %c0_i32_0 = arith.constant 0 : i32
    %c0_i32_1 = arith.constant 0 : i32
    return %c0_i32, %c0_i32_0 : i32, i32
  }
  func.func @transform_7(%arg0: i32) -> (i32, i32) {
    %c0_i32 = arith.constant 0 : i32
    %c0_i32_0 = arith.constant 0 : i32
    %c0_i32_1 = arith.constant 0 : i32
    return %c0_i32, %c0_i32_0 : i32, i32
  }
  func.func @transform_8(%arg0: i32) -> (i32, i32) {
    %c0_i32 = arith.constant 0 : i32
    %c0_i32_0 = arith.constant 0 : i32
    %c0_i32_1 = arith.constant 0 : i32
    return %c0_i32, %c0_i32_0 : i32, i32
  }
  func.func @transform_9(%arg0: i32) -> (i32, i32) {
    %c0_i32 = arith.constant 0 : i32
    %c0_i32_0 = arith.constant 0 : i32
    %c0_i32_1 = arith.constant 0 : i32
    return %c0_i32, %c0_i32_0 : i32, i32
  }
  func.func @transform_10(%arg0: i32) -> (i32, i32) {
    %c0_i32 = arith.constant 0 : i32
    %c0_i32_0 = arith.constant 0 : i32
    %c0_i32_1 = arith.constant 0 : i32
    return %c0_i32, %c0_i32_0 : i32, i32
  }
  func.func @transform_11(%arg0: i32) -> (i32, i32) {
    %c0_i32 = arith.constant 0 : i32
    %c0_i32_0 = arith.constant 0 : i32
    %c0_i32_1 = arith.constant 0 : i32
    return %c0_i32, %c0_i32_0 : i32, i32
  }
  func.func @transform_12(%arg0: i32) -> (i32, i32) {
    %c0_i32 = arith.constant 0 : i32
    %c0_i32_0 = arith.constant 0 : i32
    %c0_i32_1 = arith.constant 0 : i32
    return %c0_i32, %c0_i32_0 : i32, i32
  }
  func.func @transform_13(%arg0: i32) -> (i32, i32) {
    %c0_i32 = arith.constant 0 : i32
    %c0_i32_0 = arith.constant 0 : i32
    %c0_i32_1 = arith.constant 0 : i32
    return %c0_i32, %c0_i32_0 : i32, i32
  }
  func.func @transform_14(%arg0: i32) -> (i32, i32, i32) {
    %c0_i32 = arith.constant 0 : i32
    %c0_i32_0 = arith.constant 0 : i32
    %c0_i32_1 = arith.constant 0 : i32
    return %arg0, %c0_i32, %c0_i32_0 : i32, i32, i32
  }
}

</mosaic_0001>

<bundles_post_ra>
// kernel: tpu_custom_call.1
= control target key start
LH: loop header
LB: loop body
LE: loop exit
PB: predicated region body
PF: predicated region fallthrough
CT: control target
= control target key end

     0   :  { %s2475_s0 = inlined_call_operand.vmem [shape: f32[8,64,16], index: 0, kind: input, shape index: {}]   ;;  %s2476_s1 = inlined_call_operand.vmem [shape: bf16[16,64], index: 1, kind: input, shape index: {}]   ;;  %s2477_s2 = inlined_call_operand.vmem [shape: f32[1,64], index: 2, kind: input, shape index: {}]   ;;  %s2478_s3 = inlined_call_operand.vmem [shape: bf16[64,48], index: 3, kind: input, shape index: {}]   ;;  %s2479_s4 = inlined_call_operand.vmem [shape: f32[1,48], index: 4, kind: input, shape index: {}]   ;;  %s2480_s5 = inlined_call_operand.vmem [shape: bf16[48,96], index: 5, kind: input, shape index: {}]   ;;  %s2481_s6 = inlined_call_operand.vmem [shape: f32[1,96], index: 6, kind: input, shape index: {}]   ;;  %s2482_s7 = inlined_call_operand.vmem [shape: bf16[96,128], index: 7, kind: input, shape index: {}]   ;;  %s2483_s8 = inlined_call_operand.vmem [shape: f32[1,128], index: 8, kind: input, shape index: {}]   ;;  %s2484_s9 = inlined_call_operand.vmem [shape: bf16[128,64], index: 9, kind: input, shape index: {}]   ;;  %s2485_s10 = inlined_call_operand.vmem [shape: f32[1,64], index: 10, kind: input, shape index: {}]   ;;  %s2486_s11 = inlined_call_operand.vmem [shape: bf16[64,64], index: 11, kind: input, shape index: {}]   ;;  %s2487_s12 = inlined_call_operand.vmem [shape: f32[1,64], index: 12, kind: input, shape index: {}]   ;;  %s2488_s13 = inlined_call_operand.vmem [shape: bf16[64,64], index: 13, kind: input, shape index: {}]   ;;  %s2489_s14 = inlined_call_operand.hbm [shape: f32[8,64,128], index: 14, kind: output, shape index: {}]  }
   0x1   :  { %2490 = sst [smem:[#allocation5_spill]] %s2475_s0 }
   0x2   :  { %2491 = sst [smem:[#allocation6_spill]] %s2476_s1 }
   0x3   :  { %2492 = sst [smem:[#allocation7_spill]] %s2477_s2 }
   0x4   :  { %19 = vsyncpa [#allocation3], 0 }
   0x5   :  { %21 = vsyncpa [#allocation3 + $0x1], 0  ;;  %s2192_s29 = smov 0   ;;  %s2194_s30 = smov 0  }
   0x6   :  { %s2196_s15 = smov 0   ;;  %s2198_s16 = smov 0  }
   0x7 LB: > { %s2213_s17 = sadd.s32 4294967295, %s2111_s16   ;;  %s1609_s18 = sadd.s32 4294967294, %s2111_s16   ;;  %s2111_s16 = sphi %s2198_s16, %s2501_s16   ;;  %s2107_s15 = sphi %s2196_s15, %s2500_s15   ;;  %s2103_s30 = sphi %s2194_s30, %s2499_s30   ;;  %s2099_s29 = sphi %s2192_s29, %s2498_s29  }
   0x8   : > { %s2217_s19 = sadd.s32 1, %s2111_s16   ;;  %s333_s20 = sadd.s32 1, %s2107_s15 }
   0x9   : > { %s330_s21 = ssub.s32 %s2111_s16, %s2217_s19  ;;  %p343_p0 = scmp.ne.s32.totalorder %s2107_s15, %s2103_s30 }
   0xa   : > { %p331_p1 = scmp.eq.s32.totalorder %s330_s21, 0  ;;  %p344_p2 = scmp.eq.s32.totalorder %s2213_s17, 7 }
   0xb   : > { %p349_p3 = scmp.ne.s32.totalorder %s2103_s30, %s2099_s29  ;;  %p350_p4 = scmp.eq.s32.totalorder %s1609_s18, 7 }
   0xc   : > { %s2228_s22 = scalar_select %p331_p1, %s2107_s15, %s333_s20  }
   0xd   : > { %p2230_p5 = por %p344_p2, %p343_p0  ;;  %p2234_p6 = por %p350_p4, %p349_p3 }
   0xe   : > { %p1612_p7 = scmp.ge.s32.totalorder %s2111_s16, 1  ;;  %p415_p8 = scmp.lt.s32.totalorder %s2111_s16, 9 }
  0x10   : > { %p416_p9 = pnand %p1612_p7, %p415_p8 }
  0x11   : > { %s2495_s1 = sld [smem:[#allocation6_spill]] (!%p416_p9)  ;;  %p461_p10 = scmp.lt.s32.totalorder (!%p416_p9), %s2213_s17, 7  ;;  %vm494_vm0 = vcmask (!%p416_p9), 130048   ;;  %v1940_v13 = vld [vmem:[%s2478_s3] sm:$0xff] (!%p416_p9)   ;;  %v1941_v14 = vld [vmem:[%s2478_s3 + $0x8] sm:$0xff] (!%p416_p9)   ;;  %v1942_v15 = vld [vmem:[%s2478_s3 + $0x10] sm:$0xff] (!%p416_p9)  }
  0x12   : > { %419 = sbr.rel (%p416_p9) target bundleno = 2027 (0x7eb), region = 76  ;;  %s2496_s0 = sld [smem:[#allocation5_spill]] (!%p416_p9)  ;;  %1771 = vmatprep.subr.bf16.mxu0 (!%p416_p9), %v1940_v13  ;;  %v1943_v16 = vld [vmem:[%s2478_s3 + $0x18] sm:$0xff] (!%p416_p9)   ;;  %vm619_vm1 = vcmask (!%p416_p9), 523264   ;;  %v1944_v42 = vld [vmem:[%s2480_s5] sm:$0xff] (!%p416_p9)   ;;  %v1945_v43 = vld [vmem:[%s2480_s5 + $0x8] sm:$0xff] (!%p416_p9)  }
  0x13   : > { %1772 = vmatpush3.bf16.msra.mxu0 (!%p416_p9), %v1940_v13  ;;  %s2497_s2 = sld [smem:[#allocation7_spill]] (!%p416_p9)  ;;  %v1946_v44 = vld [vmem:[%s2480_s5 + $0x10] sm:$0xff] (!%p416_p9)   ;;  %v1947_v45 = vld [vmem:[%s2482_s7] sm:$0xff] (!%p416_p9)   ;;  %vm736_vm2 = vcmask (!%p416_p9), 392192   ;;  %vm877_vm3 = vcmask (!%p416_p9), 785408   ;;  %s2113_s20 = smov (!%p416_p9), 64  }
  0x14   : > { %1773 = vmatprep.subr.bf16.mxu0 (!%p416_p9), %v1941_v14  ;;  %v1622_v47 = vld [vmem:[%s2479_s4] ss:$0 sm:$0xff] (!%p416_p9) }
  0x17   : > { %v1939_v0 = vld [vmem:[%s2495_s1] sm:$0xff] (!%p416_p9)   ;;  %1774 = vmatpush3.bf16.msra.mxu0 (!%p416_p9), %v1941_v14 }
  0x18   : > { %1761 = vmatprep.subr.bf16.mxu1 (!%p416_p9), %v1939_v0  ;;  %1775 = vmatprep.subr.bf16.mxu0 (!%p416_p9), %v1942_v15 }
  0x19   : > { %s462_s27 = scalar_select %p461_p10, %s2213_s17, 7  ;;  %1762 = vmatpush3.bf16.msra.mxu1 %v1939_v0  ;;  %v1616_v18 = vld [vmem:[%s2497_s2] ss:$0 sm:$0xff] }
  0x1a   : > { %1801 = vmatprep.subr.bf16.mxu1 %v1947_v45 }
  0x1b   : > { %s1693_s28 = sshll.u32 %s462_s27, 6  ;;  %1776 = vmatpush3.bf16.msra.mxu0 %v1942_v15 }
  0x1c   : > { %s465_s21 = scalar_lea.vmem %s2496_s0, %s1693_s28  ;;  %1777 = vmatprep.subr.bf16.mxu0 %v1943_v16  ;;  %s1694_s0 = sshll.u32 %s2213_s17, 10 }
  0x1d   : > { %v467_v1 = vld [vmem:[%s465_s21] sm:$0xff]  ;;  %v468_v2 = vld [vmem:[%s465_s21 + $0x8] sm:$0xff]  ;;  %v469_v3 = vld [vmem:[%s465_s21 + $0x10] sm:$0xff] }
  0x1e   : > { %v475_v4 = vpack.c.bf16 %v468_v2, %v467_v1  ;;  %v470_v5 = vld [vmem:[%s465_s21 + $0x18] sm:$0xff]  ;;  %v471_v6 = vld [vmem:[%s465_s21 + $0x20] sm:$0xff]  ;;  %v472_v7 = vld [vmem:[%s465_s21 + $0x28] sm:$0xff] }
  0x1f   : > { %v476_v8 = vpack.c.bf16 %v470_v5, %v469_v3  ;;  %v477_v9 = vpack.c.bf16 %v472_v7, %v471_v6  ;;  %v473_v10 = vld [vmem:[%s465_s21 + $0x30] sm:$0xff]  ;;  %v474_v11 = vld [vmem:[%s465_s21 + $0x38] sm:$0xff]  ;;  %1778 = vmatpush3.bf16.msra.mxu0 %v1943_v16  ;;  %s458_s21 = sand.u32 1, %s2103_s30  }
  0x20   : > { %1763 = vmatprep.mubr.msk.bf16.mxu1 %vm494_vm0, %v475_v4  ;;  %v478_v12 = vpack.c.bf16 %v474_v11, %v473_v10  ;;  %1787 = vmatprep.subr.bf16.mxu0 %v1944_v42  ;;  %s1613_s25 = sshll.u32 %s458_s21, 6  ;;  %s2434_s17 = scalar_lea.sflag [#allocation3], %s458_s21 }
  0x21   : > { %1764 = vmatmul.mubr.msk.bf16.vlgmr.msra.gmra.mrb[0].mxu1 %vm494_vm0, %v476_v8  ;;  %s460_s26 = scalar_lea.vmem [#allocation2], %s1613_s25 }
  0x22   : > { %1767 = vmatprep.mubr.msk.bf16.mxu1 %vm494_vm0, %v477_v9  ;;  %1802 = vmatpush3.bf16.msra.mxu1 %v1947_v45  ;;  %s1547_s27 = sshll.u32 %s460_s26, 4  ;;  %s2428_s27 = int_to_ptr.vmem [resolvable:$true] %s1547_s27 }
  0x23   : > { %s2049_s25 = scalar_lea.vmem %s2428_s27, 1024 }
  0x24   : > { %p2050_p11 = scmp.ne.s32.totalorder %s2428_s27, %s2049_s25 }
  0x26   : > { %p2051_p12 = pnand %p2050_p11, %p2230_p5 }
  0x28   : > { %p2052_p13 = pneg %p2051_p12 }
  0x29   : > { %1768 = vmatmul.mubr.msk.bf16.gmra.mrb[4].mxu1 %vm494_vm0, %v478_v12 }
  0xf4   : > { %v1765_v17 = vpop.f32.mrb[0].mxu1 }
  0xf5   : > { %v541_v19 = vpop.f32.mrb[1].mxu1  ;;  %v550_v21 = vadd.f32 %v1765_v17, %v1616_v18 }
  0xf6   : > { %v1766_v20 = vpop.f32.mrb[2].mxu1  ;;  %v542_v24 = vadd.f32 %v1616_v18, %v541_v19 }
  0xf7   : > { %v553_v22 = vadd.f32 %v1766_v20, %v1616_v18  ;;  %v544_v23 = vpop.f32.mrb[3].mxu1 }
  0xf8   : > { %v545_v25 = vadd.f32 %v1616_v18, %v544_v23  ;;  %v1948_v23 = vld [vmem:[%s2482_s7 + $0x8] sm:$0xff]  }
  0xf9   : > { %v573_v26 = vpack.c.bf16 %v553_v22, %v550_v21  ;;  %1803 = vmatprep.subr.bf16.mxu1 %v1948_v23 }
  0xfa   : > { %v572_v27 = vpack.c.bf16 %v545_v25, %v542_v24  ;;  %1804 = vmatpush3.bf16.msra.mxu1 %v1948_v23  ;;  %v1949_v24 = vld [vmem:[%s2482_s7 + $0x10] sm:$0xff]   ;;  %v1950_v25 = vld [vmem:[%s2482_s7 + $0x18] sm:$0xff]  }
  0xfb   : > { %1805 = vmatprep.subr.bf16.mxu1 %v1949_v24 }
  0xfc   : > { %1969 = vtanh.bf16 %v572_v27  ;;  %v1769_v28 = vpop.f32.mrb[4].mxu1  ;;  %v1952_v27 = vld [vmem:[%s2482_s7 + $0x28] sm:$0xff]  }
  0xfd   : > { %1971 = vtanh.bf16 %v573_v26  ;;  %v557_v29 = vpop.f32.mrb[5].mxu1  ;;  %v566_v31 = vadd.f32 %v1769_v28, %v1616_v18  ;;  %v1951_v26 = vld [vmem:[%s2482_s7 + $0x20] sm:$0xff]  }
  0xfe   : > { %v1770_v30 = vpop.f32.mrb[6].mxu1  ;;  %v558_v34 = vadd.f32 %v1616_v18, %v557_v29  ;;  %1806 = vmatpush3.bf16.msra.mxu1 %v1949_v24  ;;  %v1953_v28 = vld [vmem:[%s2484_s9] sm:$0xff]   ;;  %v1954_v29 = vld [vmem:[%s2484_s9 + $0x8] sm:$0xff]  }
  0xff   : > { %v569_v32 = vadd.f32 %v1770_v30, %v1616_v18  ;;  %v560_v33 = vpop.f32.mrb[7].mxu1  ;;  %1807 = vmatprep.subr.bf16.mxu1 %v1950_v25  ;;  %v1955_v30 = vld [vmem:[%s2484_s9 + $0x10] sm:$0xff]  }
 0x100   : > { %v561_v35 = vadd.f32 %v1616_v18, %v560_v33 }
 0x101   : > { %v575_v36 = vpack.c.bf16 %v569_v32, %v566_v31  ;;  %v1631_v32 = vld [vmem:[%s2481_s6] ss:$0 sm:$0xff] }
 0x102   : > { %v574_v37 = vpack.c.bf16 %v561_v35, %v558_v34  ;;  %1808 = vmatpush3.bf16.msra.mxu1 %v1950_v25 }
 0x103   : > { %1809 = vmatprep.subr.bf16.mxu1 %v1951_v26 }
 0x104   : > { %1973 = vtanh.bf16 %v574_v37 }
 0x105   : > { %1975 = vtanh.bf16 %v575_v36 }
 0x106   : > { %1810 = vmatpush3.bf16.msra.mxu1 %v1951_v26 }
 0x107   : > { %v1970_v38 = vpop.eup %1969  ;;  %1811 = vmatprep.subr.bf16.mxu1 %v1952_v27 }
 0x108   : > { %v1972_v39 = vpop.eup %1971  ;;  %1779 = vmatprep.mubr.msk.bf16.mxu0 %vm619_vm1, %v1970_v38 }
 0x109   : > { %1780 = vmatmul.mubr.msk.bf16.vlgmr.msra.gmra.mrb[0].mxu0 %vm619_vm1, %v1972_v39 }
 0x10a   : > { %1788 = vmatpush3.bf16.msra.mxu0 %v1944_v42  ;;  %1812 = vmatpush3.bf16.msra.mxu1 %v1952_v27 }
 0x10b   : > { %1789 = vmatprep.subr.bf16.mxu0 %v1945_v43 }
 0x10e   : > { %1790 = vmatpush3.bf16.msra.mxu0 %v1945_v43 }
 0x10f   : > { %v1974_v40 = vpop.eup %1973  ;;  %1791 = vmatprep.subr.bf16.mxu0 %v1946_v44 }
 0x110   : > { %v1976_v41 = vpop.eup %1975  ;;  %1783 = vmatprep.mubr.msk.bf16.mxu0 %vm619_vm1, %v1974_v40 }
 0x111   : > { %1784 = vmatmul.mubr.msk.bf16.gmra.mrb[4].mxu0 %vm619_vm1, %v1976_v41 }
 0x112   : > { %1792 = vmatpush3.bf16.msra.mxu0 %v1946_v44 }
 0x113   : > { %1821 = vmatprep.subr.bf16.mxu0 %v1953_v28 }
 0x1dc   : > { %v1781_v46 = vpop.f32.mrb[0].mxu0 }
 0x1dd   : > { %v666_v48 = vpop.f32.mrb[1].mxu0  ;;  %v675_v50 = vadd.f32 %v1781_v46, %v1622_v47 }
 0x1de   : > { %v1782_v49 = vpop.f32.mrb[2].mxu0  ;;  %v667_v53 = vadd.f32 %v1622_v47, %v666_v48 }
 0x1df   : > { %v678_v51 = vadd.f32 %v1782_v49, %v1622_v47  ;;  %v669_v52 = vpop.f32.mrb[3].mxu0 }
 0x1e0   : > { %v670_v54 = vadd.f32 %v1622_v47, %v669_v52 }
 0x1e1   : > { %v698_v55 = vpack.c.bf16 %v678_v51, %v675_v50 }
 0x1e2   : > { %v697_v56 = vpack.c.bf16 %v670_v54, %v667_v53 }
 0x1e3   : > { %1977 = vtanh.bf16 %v698_v55 }
 0x1e4   : > { %1979 = vtanh.bf16 %v697_v56  ;;  %v1785_v57 = vpop.f32.mrb[4].mxu0  ;;  %v1956_v56 = vld [vmem:[%s2484_s9 + $0x18] sm:$0xff]  }
 0x1e5   : > { %v682_v58 = vpop.f32.mrb[5].mxu0  ;;  %v691_v60 = vadd.f32 %v1785_v57, %v1622_v47  ;;  %v1957_v57 = vld [vmem:[%s2484_s9 + $0x20] sm:$0xff]  }
 0x1e6   : > { %v1786_v59 = vpop.f32.mrb[6].mxu0  ;;  %v683_v63 = vadd.f32 %v1622_v47, %v682_v58  ;;  %v1958_v58 = vld [vmem:[%s2484_s9 + $0x28] sm:$0xff]  }
 0x1e7   : > { %v694_v61 = vadd.f32 %v1786_v59, %v1622_v47  ;;  %v685_v62 = vpop.f32.mrb[7].mxu0  ;;  %v1959_v59 = vld [vmem:[%s2484_s9 + $0x30] sm:$0xff]  }
 0x1e8   : > { %v686_v0 = vadd.f32 %v1622_v47, %v685_v62  ;;  %v1639_v62 = vld [vmem:[%s2483_s8] ss:$0 sm:$0xff] }
 0x1e9   : > { %v700_v1 = vpack.c.bf16 %v694_v61, %v691_v60  ;;  %v1960_v60 = vld [vmem:[%s2484_s9 + $0x38] sm:$0xff]  }
 0x1ea   : > { %v699_v2 = vpack.c.bf16 %v686_v0, %v683_v63 }
 0x1eb   : > { %1981 = vtanh.bf16 %v700_v1 }
 0x1ec   : > { %1983 = vtanh.bf16 %v699_v2 }
 0x1ee   : > { %v1978_v3 = vpop.eup %1977 }
 0x1ef   : > { %v1980_v4 = vpop.eup %1979  ;;  %v1471_v5 = vunpack.c.l.bf16 %v1978_v3  ;;  %v1472_v6 = vunpack.c.h.bf16 %v1978_v3 }
 0x1f0   : > { %1793 = vmatprep.mubr.msk.bf16.mxu0 %vm736_vm2, %v1980_v4  ;;  %v1469_v7 = vunpack.c.l.bf16 %v1980_v4  ;;  %v1470_v8 = vunpack.c.h.bf16 %v1980_v4 }
 0x1f1   : > { %1794 = vmatmul.mubr.msk.bf16.vlgmr.msra.gmra.mrb[8].mxu0 %vm736_vm2, %v1978_v3  ;;  %v2285_v9 = vsel %vm736_vm2, %v1471_v5, 0.0  ;;  %v2288_v10 = vsel %vm736_vm2, %v1472_v6, 0.0 }
 0x1f2   : > { %v2291_v11 = vsel %vm736_vm2, %v1469_v7, 0.0  ;;  %v2294_v12 = vsel %vm736_vm2, %v1470_v8, 0.0  ;;  %1822 = vmatpush3.bf16.msra.mxu0 %v1953_v28 }
 0x1f3   : > { %1823 = vmatprep.subr.bf16.mxu0 %v1954_v29 }
 0x1f6   : > { %v1982_v13 = vpop.eup %1981  ;;  %1824 = vmatpush3.bf16.msra.mxu0 %v1954_v29 }
 0x1f7   : > { %v1984_v14 = vpop.eup %1983  ;;  %v1475_v15 = vunpack.c.l.bf16 %v1982_v13  ;;  %v1476_v16 = vunpack.c.h.bf16 %v1982_v13  ;;  %1825 = vmatprep.subr.bf16.mxu0 %v1955_v30 }
 0x1f8   : > { %1797 = vmatprep.mubr.msk.bf16.mxu0 %vm736_vm2, %v1984_v14  ;;  %v1473_v17 = vunpack.c.l.bf16 %v1984_v14  ;;  %v1474_v18 = vunpack.c.h.bf16 %v1984_v14 }
 0x1f9   : > { %1798 = vmatmul.mubr.msk.bf16.gmra.mrb[12].mxu0 %vm736_vm2, %v1982_v13  ;;  %v2299_v19 = vsel %vm736_vm2, %v1475_v15, 0.0  ;;  %v2302_v20 = vsel %vm736_vm2, %v1476_v16, 0.0 }
 0x1fa   : > { %v2305_v21 = vsel %vm736_vm2, %v1473_v17, 0.0  ;;  %v2308_v22 = vsel %vm736_vm2, %v1474_v18, 0.0  ;;  %1826 = vmatpush3.bf16.msra.mxu0 %v1955_v30  ;;  %v1961_v30 = vld [vmem:[%s2486_s11] sm:$0xff]  }
 0x1fb   : > { %1827 = vmatprep.subr.bf16.mxu0 %v1956_v56  ;;  %1845 = vmatprep.subr.bf16.mxu1 %v1961_v30 }
 0x1fe   : > { %1828 = vmatpush3.bf16.msra.mxu0 %v1956_v56 }
 0x1ff   : > { %1829 = vmatprep.subr.bf16.mxu0 %v1957_v57 }
 0x202   : > { %1830 = vmatpush3.bf16.msra.mxu0 %v1957_v57 }
 0x203   : > { %1831 = vmatprep.subr.bf16.mxu0 %v1958_v58 }
 0x206   : > { %1832 = vmatpush3.bf16.msra.mxu0 %v1958_v58 }
 0x207   : > { %1833 = vmatprep.subr.bf16.mxu0 %v1959_v59 }
 0x20a   : > { %1834 = vmatpush3.bf16.msra.mxu0 %v1959_v59  ;;  %v1965_v59 = vld [vmem:[%s2488_s13] sm:$0xff]  }
 0x20b   : > { %1835 = vmatprep.subr.bf16.mxu0 %v1960_v60 }
 0x20e   : > { %1836 = vmatpush3.bf16.msra.mxu0 %v1960_v60  ;;  %v1966_v60 = vld [vmem:[%s2488_s13 + $0x8] sm:$0xff]  }
 0x20f   : > { %1861 = vmatprep.subr.bf16.mxu0 %v1965_v59 }
 0x2c4   : > { %v1795_v31 = vpop.f32.mrb[8].mxu0 }
 0x2c5   : > { %v783_v33 = vpop.f32.mrb[9].mxu0  ;;  %v792_v35 = vadd.f32 %v1795_v31, %v1631_v32  ;;  %v1962_v31 = vld [vmem:[%s2486_s11 + $0x8] sm:$0xff]  }
 0x2c6   : > { %v1796_v34 = vpop.f32.mrb[10].mxu0  ;;  %v784_v38 = vadd.f32 %v1631_v32, %v783_v33  ;;  %v1964_v33 = vld [vmem:[%s2486_s11 + $0x18] sm:$0xff]  }
 0x2c7   : > { %v795_v36 = vadd.f32 %v1796_v34, %v1631_v32  ;;  %v786_v37 = vpop.f32.mrb[11].mxu0 }
 0x2c8   : > { %v787_v39 = vadd.f32 %v1631_v32, %v786_v37 }
 0x2c9   : > { %v815_v40 = vpack.c.bf16 %v795_v36, %v792_v35  ;;  %v1650_v35 = vld [vmem:[%s2485_s10] ss:$0 sm:$0xff] }
 0x2ca   : > { %v814_v41 = vpack.c.bf16 %v787_v39, %v784_v38 }
 0x2cc   : > { %1985 = vtanh.bf16 %v814_v41  ;;  %v1799_v42 = vpop.f32.mrb[12].mxu0 }
 0x2cd   : > { %1987 = vtanh.bf16 %v815_v40  ;;  %v799_v43 = vpop.f32.mrb[13].mxu0  ;;  %v808_v45 = vadd.f32 %v1799_v42, %v1631_v32 }
 0x2ce   : > { %v1800_v44 = vpop.f32.mrb[14].mxu0  ;;  %v800_v48 = vadd.f32 %v1631_v32, %v799_v43 }
 0x2cf   : > { %v811_v46 = vadd.f32 %v1800_v44, %v1631_v32  ;;  %v802_v47 = vpop.f32.mrb[15].mxu0 }
 0x2d0   : > { %v803_v49 = vadd.f32 %v1631_v32, %v802_v47  ;;  %v1963_v32 = vld [vmem:[%s2486_s11 + $0x10] sm:$0xff]  }
 0x2d1   : > { %v817_v50 = vpack.c.bf16 %v811_v46, %v808_v45 }
 0x2d2   : > { %v816_v51 = vpack.c.bf16 %v803_v49, %v800_v48 }
 0x2d4   : > { %1989 = vtanh.bf16 %v816_v51 }
 0x2d5   : > { %1991 = vtanh.bf16 %v817_v50 }
 0x2d7   : > { %v1986_v52 = vpop.eup %1985 }
 0x2d8   : > { %v1988_v53 = vpop.eup %1987  ;;  %1813 = vmatprep.mubr.msk.bf16.mxu1 %vm877_vm3, %v1986_v52 }
 0x2d9   : > { %1814 = vmatmul.mubr.msk.bf16.vlgmr.msra.gmra.mrb[8].mxu1 %vm877_vm3, %v1988_v53 }
 0x2da   : > { %1846 = vmatpush3.bf16.msra.mxu1 %v1961_v30 }
 0x2db   : > { %1847 = vmatprep.subr.bf16.mxu1 %v1962_v31 }
 0x2de   : > { %1848 = vmatpush3.bf16.msra.mxu1 %v1962_v31 }
 0x2df   : > { %v1990_v54 = vpop.eup %1989  ;;  %1849 = vmatprep.subr.bf16.mxu1 %v1963_v32 }
 0x2e0   : > { %v1992_v55 = vpop.eup %1991  ;;  %1817 = vmatprep.mubr.msk.bf16.mxu1 %vm877_vm3, %v1990_v54 }
 0x2e1   : > { %1818 = vmatmul.mubr.msk.bf16.gmra.mrb[12].mxu1 %vm877_vm3, %v1992_v55 }
 0x2e2   : > { %1850 = vmatpush3.bf16.msra.mxu1 %v1963_v32 }
 0x2e3   : > { %1851 = vmatprep.subr.bf16.mxu1 %v1964_v33 }
 0x2e6   : > { %1852 = vmatpush3.bf16.msra.mxu1 %v1964_v33 }
 0x3ac   : > { %v1815_v61 = vpop.f32.mrb[8].mxu1 }
 0x3ad   : > { %v924_v63 = vpop.f32.mrb[9].mxu1  ;;  %v933_v1 = vadd.f32 %v1815_v61, %v1639_v62  ;;  %v1967_v61 = vld [vmem:[%s2488_s13 + $0x10] sm:$0xff]  }
 0x3ae   : > { %v1816_v0 = vpop.f32.mrb[10].mxu1  ;;  %v925_v4 = vadd.f32 %v1639_v62, %v924_v63 }
 0x3af   : > { %v936_v2 = vadd.f32 %v1816_v0, %v1639_v62  ;;  %v927_v3 = vpop.f32.mrb[11].mxu1  ;;  %v1659_v0 = vld [vmem:[%s2487_s12] ss:$0 sm:$0xff] }
 0x3b0   : > { %v928_v5 = vadd.f32 %v1639_v62, %v927_v3 }
 0x3b1   : > { %v956_v6 = vpack.c.bf16 %v936_v2, %v933_v1 }
 0x3b2   : > { %v955_v7 = vpack.c.bf16 %v928_v5, %v925_v4 }
 0x3b4   : > { %1993 = vtanh.bf16 %v955_v7  ;;  %v1819_v8 = vpop.f32.mrb[12].mxu1 }
 0x3b5   : > { %1995 = vtanh.bf16 %v956_v6  ;;  %v940_v13 = vpop.f32.mrb[13].mxu1  ;;  %v949_v15 = vadd.f32 %v1819_v8, %v1639_v62 }
 0x3b6   : > { %v1820_v14 = vpop.f32.mrb[14].mxu1  ;;  %v941_v18 = vadd.f32 %v1639_v62, %v940_v13 }
 0x3b7   : > { %v952_v16 = vadd.f32 %v1820_v14, %v1639_v62  ;;  %v943_v17 = vpop.f32.mrb[15].mxu1 }
 0x3b8   : > { %v944_v23 = vadd.f32 %v1639_v62, %v943_v17  ;;  %v1968_v62 = vld [vmem:[%s2488_s13 + $0x18] sm:$0xff]  }
 0x3b9   : > { %v958_v24 = vpack.c.bf16 %v952_v16, %v949_v15 }
 0x3ba   : > { %v957_v25 = vpack.c.bf16 %v944_v23, %v941_v18 }
 0x3bc   : > { %1997 = vtanh.bf16 %v957_v25 }
 0x3bd   : > { %1999 = vtanh.bf16 %v958_v24 }
 0x3bf   : > { %v1994_v26 = vpop.eup %1993 }
 0x3c0   : > { %v1996_v27 = vpop.eup %1995  ;;  %1837 = vmatprep.mubr.bf16.mxu0 %v1994_v26 }
 0x3c1   : > { %1838 = vmatmul.mubr.bf16.vlgmr.msra.gmra.mrb[16].mxu0 %v1996_v27 }
 0x3c2   : > { %1862 = vmatpush3.bf16.msra.mxu0 %v1965_v59 }
 0x3c3   : > { %1863 = vmatprep.subr.bf16.mxu0 %v1966_v60 }
 0x3c6   : > { %1864 = vmatpush3.bf16.msra.mxu0 %v1966_v60 }
 0x3c7   : > { %v1998_v28 = vpop.eup %1997  ;;  %1865 = vmatprep.subr.bf16.mxu0 %v1967_v61 }
 0x3c8   : > { %v2000_v29 = vpop.eup %1999  ;;  %1841 = vmatprep.mubr.bf16.mxu0 %v1998_v28 }
 0x3c9   : > { %1842 = vmatmul.mubr.bf16.gmra.mrb[20].mxu0 %v2000_v29 }
 0x3ca   : > { %1866 = vmatpush3.bf16.msra.mxu0 %v1967_v61 }
 0x3cb   : > { %1867 = vmatprep.subr.bf16.mxu0 %v1968_v62 }
 0x3ce   : > { %1868 = vmatpush3.bf16.msra.mxu0 %v1968_v62 }
 0x494   : > { %v1839_v34 = vpop.f32.mrb[16].mxu0 }
 0x495   : > { %v1068_v36 = vpop.f32.mrb[17].mxu0  ;;  %v1077_v38 = vadd.f32 %v1839_v34, %v1650_v35 }
 0x496   : > { %v1840_v37 = vpop.f32.mrb[18].mxu0  ;;  %v1069_v41 = vadd.f32 %v1650_v35, %v1068_v36 }
 0x497   : > { %v1080_v39 = vadd.f32 %v1840_v37, %v1650_v35  ;;  %v1071_v40 = vpop.f32.mrb[19].mxu0 }
 0x498   : > { %v1072_v42 = vadd.f32 %v1650_v35, %v1071_v40 }
 0x499   : > { %v1100_v43 = vpack.c.bf16 %v1080_v39, %v1077_v38 }
 0x49a   : > { %v1099_v44 = vpack.c.bf16 %v1072_v42, %v1069_v41 }
 0x49c   : > { %2001 = vtanh.bf16 %v1099_v44  ;;  %v1843_v45 = vpop.f32.mrb[20].mxu0 }
 0x49d   : > { %2003 = vtanh.bf16 %v1100_v43  ;;  %v1084_v46 = vpop.f32.mrb[21].mxu0  ;;  %v1093_v48 = vadd.f32 %v1843_v45, %v1650_v35 }
 0x49e   : > { %v1844_v47 = vpop.f32.mrb[22].mxu0  ;;  %v1085_v51 = vadd.f32 %v1650_v35, %v1084_v46 }
 0x49f   : > { %v1096_v49 = vadd.f32 %v1844_v47, %v1650_v35  ;;  %v1087_v50 = vpop.f32.mrb[23].mxu0 }
 0x4a0   : > { %v1088_v52 = vadd.f32 %v1650_v35, %v1087_v50 }
 0x4a1   : > { %v1102_v53 = vpack.c.bf16 %v1096_v49, %v1093_v48 }
 0x4a2   : > { %v1101_v54 = vpack.c.bf16 %v1088_v52, %v1085_v51 }
 0x4a4   : > { %2005 = vtanh.bf16 %v1101_v54 }
 0x4a5   : > { %2007 = vtanh.bf16 %v1102_v53 }
 0x4a7   : > { %v2002_v55 = vpop.eup %2001 }
 0x4a8   : > { %v2004_v56 = vpop.eup %2003  ;;  %1853 = vmatprep.mubr.msk.bf16.mxu1 %vm619_vm1, %v2002_v55 }
 0x4a9   : > { %1854 = vmatmul.mubr.msk.bf16.vlgmr.msra.gmra.mrb[16].mxu1 %vm619_vm1, %v2004_v56 }
 0x4af   : > { %v2006_v57 = vpop.eup %2005 }
 0x4b0   : > { %v2008_v58 = vpop.eup %2007  ;;  %1857 = vmatprep.mubr.msk.bf16.mxu1 %vm619_vm1, %v2006_v57 }
 0x4b1   : > { %1858 = vmatmul.mubr.msk.bf16.gmra.mrb[20].mxu1 %vm619_vm1, %v2008_v58 }
 0x57c   : > { %v1855_v63 = vpop.f32.mrb[16].mxu1 }
 0x57d   : > { %v1192_v1 = vpop.f32.mrb[17].mxu1  ;;  %v1201_v3 = vadd.f32 %v1855_v63, %v1659_v0 }
 0x57e   : > { %v1856_v2 = vpop.f32.mrb[18].mxu1  ;;  %v1193_v6 = vadd.f32 %v1659_v0, %v1192_v1 }
 0x57f   : > { %v1204_v4 = vadd.f32 %v1856_v2, %v1659_v0  ;;  %v1195_v5 = vpop.f32.mrb[19].mxu1 }
 0x580   : > { %v1196_v7 = vadd.f32 %v1659_v0, %v1195_v5 }
 0x581   : > { %v1224_v8 = vpack.c.bf16 %v1204_v4, %v1201_v3 }
 0x582   : > { %v1223_v13 = vpack.c.bf16 %v1196_v7, %v1193_v6 }
 0x584   : > { %2009 = vtanh.bf16 %v1223_v13  ;;  %v1859_v14 = vpop.f32.mrb[20].mxu1 }
 0x585   : > { %2011 = vtanh.bf16 %v1224_v8  ;;  %v1208_v15 = vpop.f32.mrb[21].mxu1  ;;  %v1217_v17 = vadd.f32 %v1859_v14, %v1659_v0 }
 0x586   : > { %v1860_v16 = vpop.f32.mrb[22].mxu1  ;;  %v1209_v24 = vadd.f32 %v1659_v0, %v1208_v15 }
 0x587   : > { %v1220_v18 = vadd.f32 %v1860_v16, %v1659_v0  ;;  %v1211_v23 = vpop.f32.mrb[23].mxu1 }
 0x588   : > { %v1212_v25 = vadd.f32 %v1659_v0, %v1211_v23 }
 0x589   : > { %v1226_v26 = vpack.c.bf16 %v1220_v18, %v1217_v17 }
 0x58a   : > { %v1225_v27 = vpack.c.bf16 %v1212_v25, %v1209_v24 }
 0x58c   : > { %2013 = vtanh.bf16 %v1225_v27 }
 0x58d   : > { %2015 = vtanh.bf16 %v1226_v26 }
 0x58f   : > { %v2010_v28 = vpop.eup %2009 }
 0x590   : > { %v2012_v29 = vpop.eup %2011  ;;  %1869 = vmatprep.mubr.msk.bf16.mxu0 %vm619_vm1, %v2010_v28  ;;  %1893 = vmatprep.subr.msk.bf16.mxu1 %vm619_vm1, %v2010_v28  ;;  %v1264_v30 = vsel %vm619_vm1, %v2010_v28, 0 }
 0x591   : > { %1870 = vmatmul.mubr.msk.bf16.vlgmr.msra.gmra.mrb[24].mxu0 %vm619_vm1, %v2012_v29  ;;  %1878 = vmatpush3.bf16.xpose.msra.mxu1 %v1264_v30  ;;  %v1267_v33 = vsel %vm619_vm1, %v2012_v29, 0 }
 0x592   : > { %1894 = vmatprep.subr.msk.bf16.mxu1 %vm619_vm1, %v2012_v29 }
 0x597   : > { %v2014_v31 = vpop.eup %2013 }
 0x598   : > { %v2016_v32 = vpop.eup %2015  ;;  %1873 = vmatprep.mubr.msk.bf16.mxu0 %vm619_vm1, %v2014_v31  ;;  %v1270_v34 = vsel %vm619_vm1, %v2014_v31, 0 }
 0x599   : > { %1874 = vmatmul.mubr.msk.bf16.gmra.mrb[28].mxu0 %vm619_vm1, %v2016_v32  ;;  %1880 = vmatpush3.bf16.xpose.msra.mxu1 %v1267_v33  ;;  %v1273_v35 = vsel %vm619_vm1, %v2016_v32, 0 }
 0x59a   : > { %1895 = vmatprep.subr.msk.bf16.mxu1 %vm619_vm1, %v2014_v31 }
 0x5a1   : > { %1882 = vmatpush3.bf16.xpose.msra.mxu1 %v1270_v34 }
 0x5a2   : > { %1896 = vmatprep.subr.msk.bf16.mxu1 %vm619_vm1, %v2016_v32 }
 0x5a9   : > { %1884 = vmatpush3.bf16.xpose.msra.mxu1 %v1273_v35 }
 0x664   : > { %v1871_v36 = vpop.f32.mrb[24].mxu0 }
 0x665   : > { %v1309_v37 = vpop.f32.mrb[25].mxu0 }
 0x666   : > { %v1872_v38 = vpop.f32.mrb[26].mxu0 }
 0x667   : > { %v1341_v39 = vpack.c.bf16 %v1872_v38, %v1871_v36  ;;  %v1312_v40 = vpop.f32.mrb[27].mxu0 }
 0x668   : > { %v1340_v41 = vpack.c.bf16 %v1312_v40, %v1309_v37 }
 0x66a   : > { %1885 = vmatprep.mubr.msk.bf16.mxu1 %vm619_vm1, %v1340_v41 }
 0x66b   : > { %1886 = vmatmul.mubr.msk.bf16.vlgmr.msra.gmra.mrb[24].mxu1 %vm619_vm1, %v1341_v39 }
 0x66c   : > { %v1875_v42 = vpop.f32.mrb[28].mxu0 }
 0x66d   : > { %v1325_v43 = vpop.f32.mrb[29].mxu0 }
 0x66e   : > { %v1876_v44 = vpop.f32.mrb[30].mxu0 }
 0x66f   : > { %v1343_v45 = vpack.c.bf16 %v1876_v44, %v1875_v42  ;;  %v1328_v46 = vpop.f32.mrb[31].mxu0 }
 0x670   : > { %v1342_v47 = vpack.c.bf16 %v1328_v46, %v1325_v43 }
 0x672   : > { %1889 = vmatprep.mubr.msk.bf16.mxu1 %vm619_vm1, %v1342_v47 }
 0x673   : > { %1890 = vmatmul.mubr.msk.bf16.gmra.mrb[28].mxu1 %vm619_vm1, %v1343_v45 }
 0x73e   : > { %v1887_v48 = vpop.f32.mrb[24].mxu1 }
 0x73f   : > { %v1682_v49 = vmul.f32 -1.442695, %v1887_v48  ;;  %v1390_v50 = vpop.f32.mrb[25].mxu1 }
 0x740   : > { %v1680_v51 = vmul.f32 -1.442695, %v1390_v50  ;;  %v1888_v52 = vpop.f32.mrb[26].mxu1 }
 0x741   : > { %2017 = vpow2.f32 %v1682_v49  ;;  %v1683_v53 = vmul.f32 -1.442695, %v1888_v52  ;;  %v1393_v54 = vpop.f32.mrb[27].mxu1 }
 0x742   : > { %2019 = vpow2.f32 %v1680_v51  ;;  %v1681_v55 = vmul.f32 -1.442695, %v1393_v54 }
 0x743   : > { %2021 = vpow2.f32 %v1683_v53 }
 0x744   : > { %2023 = vpow2.f32 %v1681_v55 }
 0x746   : > { %v1891_v56 = vpop.f32.mrb[28].mxu1 }
 0x747   : > { %v1686_v57 = vmul.f32 -1.442695, %v1891_v56  ;;  %v1406_v58 = vpop.f32.mrb[29].mxu1 }
 0x748   : > { %v1684_v59 = vmul.f32 -1.442695, %v1406_v58  ;;  %v1892_v60 = vpop.f32.mrb[30].mxu1 }
 0x749   : > { %2025 = vpow2.f32 %v1686_v57  ;;  %v1687_v61 = vmul.f32 -1.442695, %v1892_v60  ;;  %v1409_v62 = vpop.f32.mrb[31].mxu1 }
 0x74a   : > { %2027 = vpow2.f32 %v1684_v59  ;;  %v1685_v63 = vmul.f32 -1.442695, %v1409_v62 }
 0x74b   : > { %v2018_v0 = vpop.eup %2017  ;;  %2029 = vpow2.f32 %v1687_v61 }
 0x74c   : > { %v2020_v1 = vpop.eup %2019  ;;  %v1447_v2 = vadd.f32 1.0, %v2018_v0  ;;  %2031 = vpow2.f32 %v1685_v63 }
 0x74d   : > { %v2022_v3 = vpop.eup %2021  ;;  %v1445_v4 = vadd.f32 1.0, %v2020_v1 }
 0x74e   : > { %v2024_v5 = vpop.eup %2023  ;;  %2033 = vrcp.f32 %v1447_v2  ;;  %v1448_v6 = vadd.f32 1.0, %v2022_v3 }
 0x74f   : > { %2035 = vrcp.f32 %v1445_v4  ;;  %v1446_v7 = vadd.f32 1.0, %v2024_v5 }
 0x750   : > { %2037 = vrcp.f32 %v1448_v6 }
 0x751   : > { %2039 = vrcp.f32 %v1446_v7 }
 0x753   : > { %v2026_v8 = vpop.eup %2025 }
 0x754   : > { %v2028_v13 = vpop.eup %2027  ;;  %v1451_v17 = vadd.f32 1.0, %v2026_v8 }
 0x755   : > { %v2030_v14 = vpop.eup %2029  ;;  %v1449_v15 = vadd.f32 1.0, %v2028_v13 }
 0x756   : > { %v2032_v16 = vpop.eup %2031  ;;  %v1452_v25 = vadd.f32 1.0, %v2030_v14 }
 0x757   : > { %2041 = vrcp.f32 %v1449_v15  ;;  %v1450_v18 = vadd.f32 1.0, %v2032_v16 }
 0x758   : > { %v2034_v23 = vpop.eup %2033 }
 0x759   : > { %v2036_v24 = vpop.eup %2035  ;;  %2043 = vrcp.f32 %v1450_v18  ;;  %1489 = vrot.lane.b32.xlu1 %v2034_v23, %s2113_s20 }
 0x75a   : > { %1485 = vrot.lane.b32.xlu0 %v2036_v24, %s2113_s20  ;;  %2045 = vrcp.f32 %v1451_v17  ;;  %v2038_v26 = vpop.eup %2037 }
 0x75b   : > { %v2040_v27 = vpop.eup %2039  ;;  %2047 = vrcp.f32 %v1452_v25 }
 0x75d   : > { %1491 = vrot.lane.b32.xlu1 %v2038_v26, %s2113_s20 }
 0x75e   : > { %1487 = vrot.lane.b32.xlu0 %v2040_v27, %s2113_s20 }
 0x761   : > { %v2042_v28 = vpop.eup %2041 }
 0x762   : > { %1493 = vrot.lane.b32.xlu0 %v2042_v28, %s2113_s20 }
 0x763   : > { %v2044_v29 = vpop.eup %2043 }
 0x764   : > { %1495 = vrot.lane.b32.xlu1 %v2044_v29, %s2113_s20  ;;  %v2046_v30 = vpop.eup %2045 }
 0x765   : > { %v2048_v31 = vpop.eup %2047 }
 0x766   : > { %1497 = vrot.lane.b32.xlu0 %v2046_v30, %s2113_s20 }
 0x768   : > { %1499 = vrot.lane.b32.xlu1 %v2048_v31, %s2113_s20  ;;  %s2426_s20 = scalar_lea.hbm %s2489_s14, %s1694_s0  ;;  %s2114_s0 = smov [#allocation2]  }
 0x769   : > { %s2053_s28 = sshll.u32 %s2114_s0, 4  ;;  %s2054_s28 = int_to_ptr.vmem [resolvable:$false] %s2053_s28 }
 0x76a   : > { %s2055_s18 = scalar_lea.vmem %s2054_s28, 2048  ;;  %p2056_p0 = scmp.lt.s32.totalorder %s2428_s27, %s2054_s28 }
 0x76b   : > { %p2057_p1 = scmp.lt.s32.totalorder %s2055_s18, %s2049_s25 }
 0x76d   : > { %p2058_p2 = por %p2057_p1, %p2056_p0 }
 0x76f   : > { %p2059_p3 = pnand %p2058_p2, %p2052_p13 }
 0x7cb   : > { %v1490_v32 = vpop.permute.xlu1 %1489 }
 0x7cc   : > { %v1519_v33 = vsel %vm619_vm1, %v2285_v9, %v1490_v32  ;;  %v1486_v34 = vpop.permute.xlu0 %1485 }
 0x7cd   : > { %1527 = vst [vmem:[%s460_s26 + $0x10] sm:$0xff] %v1519_v33  ;;  %v1517_v35 = vsel %vm619_vm1, %v2291_v11, %v1486_v34 }
 0x7ce   : > { %1525 = vst [vmem:[%s460_s26] sm:$0xff] %v1517_v35 }
 0x7cf   : > { %v1492_v36 = vpop.permute.xlu1 %1491 }
 0x7d0   : > { %v1520_v37 = vsel %vm619_vm1, %v2288_v10, %v1492_v36  ;;  %v1488_v38 = vpop.permute.xlu0 %1487 }
 0x7d1   : > { %1528 = vst [vmem:[%s460_s26 + $0x18] sm:$0xff] %v1520_v37  ;;  %v1518_v39 = vsel %vm619_vm1, %v2294_v12, %v1488_v38 }
 0x7d2   : > { %1526 = vst [vmem:[%s460_s26 + $0x8] sm:$0xff] %v1518_v39 }
 0x7d4   : > { %v1494_v40 = vpop.permute.xlu0 %1493 }
 0x7d5   : > { %v1521_v9 = vsel %vm619_vm1, %v2305_v21, %v1494_v40 }
 0x7d6   : > { %1529 = vst [vmem:[%s460_s26 + $0x20] sm:$0xff] %v1521_v9  ;;  %v1496_v41 = vpop.permute.xlu1 %1495 }
 0x7d7   : > { %v1522_v11 = vsel %vm619_vm1, %v2308_v22, %v1496_v41 }
 0x7d8   : > { %1530 = vst [vmem:[%s460_s26 + $0x28] sm:$0xff] %v1522_v11  ;;  %v1498_v10 = vpop.permute.xlu0 %1497 }
 0x7d9   : > { %v1523_v42 = vsel %vm619_vm1, %v2299_v19, %v1498_v10 }
 0x7da   : > { %1531 = vst [vmem:[%s460_s26 + $0x30] sm:$0xff] %v1523_v42  ;;  %v1500_v12 = vpop.permute.xlu1 %1499 }
 0x7db   : > { %v1524_v21 = vsel %vm619_vm1, %v2302_v20, %v1500_v12 }
 0x7dc   : > { %1532 = vst [vmem:[%s460_s26 + $0x38] sm:$0xff] %v1524_v21 }
 0x7dd   : > { %2062 = shalt.err (!%p2059_p3)
}
 0x7de   : > { %s2063_s21 = scalar_lea.hbm %s2426_s20, 1024  ;;  %s2067_s0 = scalar_lea.hbm %s2489_s14, 8192 }
 0x7df   : > { %p2064_p4 = scmp.ne.s32.totalorder %s2426_s20, %s2063_s21  ;;  %p2068_p9 = scmp.lt.u32.totalorder %s2426_s20, %s2489_s14 }
 0x7e0   : > { %p2069_p10 = scmp.lt.u32.totalorder %s2067_s0, %s2063_s21  ;;  %p2071_p12 = scmp.lt.u32.totalorder %s2063_s21, %s2426_s20 }
 0x7e1   : > { %p2065_p7 = pnand %p2064_p4, %p2230_p5 }
 0x7e2   : > { %p2070_p11 = por %p2069_p10, %p2068_p9 }
 0x7e3   : > { %p2066_p8 = pneg %p2065_p7 }
 0x7e4   : > { %p2072_p13 = por %p2071_p12, %p2070_p11 }
 0x7e6   : > { %p2073_p0 = pnand %p2072_p13, %p2066_p8 }
 0x7e8   : > { %2076 = shalt.err (!%p2073_p0)
}
 0x7e9   : > { %s2115_s25 = smov 128   ;;  %s2116_s18 = smov 8  }
 0x7ea   : > { %1897 = dma.vmem_to_hbm [thread:$0]  (%p2230_p5), %s2428_s27, 1024, %s2426_s20, %s2434_s17, %s2115_s25, %s2115_s25, %s2116_s18  }
 0x7eb PF: > { %p1903_p1 = scmp.ge.s32.totalorder %s2111_s16, 2  ;;  %s1562_s1 = sand.u32 1, %s2099_s29  }
 0x7ec   : > { %s1563_s2 = scalar_lea.sflag [#allocation3], %s1562_s1 }
 0x7ed   : > { %p1900_p2 = pnand %p1903_p1, %p2234_p6 }
 0x7ef   : > { %2094 = dma.done.wait (!%p1900_p2), %s1563_s2, 1024  }
 0x7f0   : > { %2096 = vsyncadd (!%p1900_p2), %s1563_s2, 4294966272  ;;  %p24_p3 = scmp.ge.s32.totalorder %s2217_s19, 10   ;;  %s2498_s29 = smov %s2103_s30 }
 0x7f1   : > { %s2499_s30 = smov %s2107_s15  ;;  %s2500_s15 = smov %s2228_s22 }
 0x7f2   : > { %s2501_s16 = smov %s2217_s19  ;;  %26 = sbr.rel (!%p24_p3) target bundleno = 7 (0x7), region = 111 }
 0x7f9   :  { %1568 = vsyncpa [#allocation3], 1 }
 0x7fa   :  { %1570 = vsyncpa [#allocation3 + $0x1], 1 }

</bundles_post_ra>
